<compile_context>
chip_gen: v7x
topology: tpu7x:2x2x1
jax: 0.10.0
libtpu: 0.0.40
codegen_flags: <defaults>
</compile_context>

<pallas_src>
import numpy as np
import jax
import jax.numpy as jnp
from jax.experimental import pallas as pl
from jax.experimental.pallas import tpu as pltpu

LANE = 128
SUBLANE = 8
_SMALL_INPUT_BYTES = 256 * 1024   # below this: one full block, pipelining not needed
_MIN_GRID_STEPS = 8               # keep the pipeline busy; even count for megacore


def _vmem_budget_bytes():
    """Generation-aware budget for the double-buffered per-step working set."""
    try:
        cap = int(pltpu.get_tpu_info().vmem_capacity_bytes)
    except Exception:          # CPU tracing / interpret mode / older jax
        cap = 64 << 20         # assume the smallest (v7x-like) VMEM
    if cap >= (96 << 20):      # v5e / v6e: 128 MiB physical VMEM
        return 48 << 20
    return 24 << 20            # v7x: 64 MiB physical / 32 MiB scoped default


def _make_weighted_add_kernel(weights):
    """Kernel closing over compile-time scalar weights."""
    n = len(weights)

    def kernel(*refs):
        x_refs, o_ref = refs[:n], refs[n]
        acc = x_refs[0][...].astype(jnp.float32) * weights[0]
        for i in range(1, n):                    # static unroll (n is compile-time)
            acc = acc + x_refs[i][...].astype(jnp.float32) * weights[i]
        o_ref[...] = acc.astype(o_ref.dtype)

    return kernel


def _pick_tile_r(rows, n_inputs, in_itemsize, out_itemsize):
    """Largest row tile fitting the VMEM budget, with >= _MIN_GRID_STEPS steps."""
    sub_mult = SUBLANE * max(1, 4 // max(1, min(in_itemsize, out_itemsize)))
    if rows * LANE * in_itemsize <= _SMALL_INPUT_BYTES:
        return rows                               # single full block (full dims are legal)
    budget = _vmem_budget_bytes()
    # 2 pipeline buffers x (n inputs + 1 output) streams per grid step.
    bytes_per_row = 2 * (n_inputs * in_itemsize + out_itemsize) * LANE
    max_tile_r = max(sub_mult, budget // bytes_per_row)
    steps = max(_MIN_GRID_STEPS, pl.cdiv(rows, max_tile_r))
    steps += steps % 2                            # even step count -> clean 2-core split
    tile_r = pl.cdiv(rows, steps)
    tile_r = ((tile_r + sub_mult - 1) // sub_mult) * sub_mult
    return min(tile_r, rows)


def weighted_add(xs, weights):
    """Pallas equivalent of Add.forward: sum_i xs[i] * weights[i]."""
    n = len(xs)
    if n == 0:
        raise ValueError("need at least one input")
    if len(weights) != n:
        raise ValueError("len(weights) must match len(xs)")
    shape, dtype = xs[0].shape, xs[0].dtype
    for x in xs[1:]:
        if x.shape != shape or x.dtype != dtype:
            raise ValueError("all inputs must share shape and dtype")

    # The Add module passes Python-number weights -> bake them into the kernel.
    # (Traced/runtime weights would need a scalar-prefetch operand instead.)
    weights = tuple(float(w) for w in weights)

    # PyTorch-style promotion: integer tensors * float weights -> float output.
    out_dtype = dtype if jnp.issubdtype(dtype, jnp.floating) else jnp.float32
    in_itemsize = jnp.dtype(dtype).itemsize
    out_itemsize = jnp.dtype(out_dtype).itemsize
    total = int(np.prod(shape)) if len(shape) else 1
    if total == 0:
        return jnp.zeros(shape, out_dtype)

    kernel = _make_weighted_add_kernel(weights)
    cost = pl.CostEstimate(
        flops=2 * n * total,
        transcendentals=0,
        bytes_accessed=n * total * in_itemsize + total * out_itemsize,
    )

    # ----- ragged totals (total % 128 != 0) --------------------------------
    if total % LANE != 0:
        if total * in_itemsize <= _SMALL_INPUT_BYTES:
            # Zero-copy: one full-array block over a free (1, total) view.
            xs1 = [jnp.reshape(x, (1, total)) for x in xs]
            out = pl.pallas_call(
                kernel,
                out_shape=jax.ShapeDtypeStruct((1, total), out_dtype),
                cost_estimate=cost,
            )(*xs1)
            return out.reshape(shape)
        # Large ragged totals are rare; pad the tail to a full lane row.
        # TODO(synk): mask the <128-element tail inside the last grid block to
        # avoid this extra HBM copy per input on large ragged shapes.
        rows = pl.cdiv(total, LANE)
        pad = rows * LANE - total
        xs_2d = [jnp.reshape(jnp.pad(jnp.reshape(x, (-1,)), (0, pad)), (rows, LANE))
                 for x in xs]
    else:
        rows = total // LANE
        xs_2d = [jnp.reshape(x, (rows, LANE)) for x in xs]   # free: contiguous reshape

    # ----- tiled, double-buffered main path ---------------------------------
    tile_r = _pick_tile_r(rows, n, in_itemsize, out_itemsize)
    grid = (pl.cdiv(rows, tile_r),)
    working_set = 2 * (n * in_itemsize + out_itemsize) * tile_r * LANE
    vmem_limit = int(working_set + (16 << 20))    # working set + headroom

    x_spec = pl.BlockSpec((tile_r, LANE), lambda i: (i, 0))
    out = pl.pallas_call(
        kernel,
        out_shape=jax.ShapeDtypeStruct((rows, LANE), out_dtype),
        grid_spec=pl.GridSpec(
            grid=grid,
            in_specs=[x_spec] * n,
            out_specs=pl.BlockSpec((tile_r, LANE), lambda i: (i, 0)),
        ),
        compiler_params=pltpu.CompilerParams(
            dimension_semantics=("parallel",),
            vmem_limit_bytes=vmem_limit,
        ),
        cost_estimate=cost,
    )(*xs_2d)

    if rows * LANE != total:                      # only in the pad fallback
        out = out.reshape(-1)[:total]
    return out.reshape(shape)


if __name__ == "__main__":
    key = jax.random.PRNGKey(0)
    k1, k2, k3 = jax.random.split(key, 3)
    shape = (2, 4, 16, 16)  # NCHW
    xs = [
        jax.random.normal(k1, shape, jnp.float32),
        jax.random.normal(k2, shape, jnp.float32),
        jax.random.normal(k3, shape, jnp.float32),
    ]
    weights = [0.5, 1.5, -2.0]  # module receives weights at call time

    out = weighted_add(xs, weights)
    jax.block_until_ready(out)

    ref = sum(x * w for x, w in zip(xs, weights))
    np.testing.assert_allclose(np.asarray(out), np.asarray(ref), rtol=1e-6, atol=1e-6)
    print("KERNEL_OK")
</pallas_src>

<mosaic_0001>
module attributes {stable_mosaic.version = 11 : i64} {
  func.func @kernel(%arg0: i32, %arg1: memref<16x128xf32, #tpu.memory_space<vmem>>, %arg2: memref<16x128xf32, #tpu.memory_space<vmem>>, %arg3: memref<16x128xf32, #tpu.memory_space<vmem>>, %arg4: memref<16x128xf32, #tpu.memory_space<vmem>>) attributes {dimension_semantics = [#tpu.dimension_semantics<parallel>], iteration_bounds = array<i64: 1>, scalar_prefetch = 0 : i64, scratch_operands = 0 : i64, tpu.core_type = #tpu.core_type<tc>, window_params = [{transform_indices = @transform_0, window_bounds = array<i64: 16, 128>}, {transform_indices = @transform_1, window_bounds = array<i64: 16, 128>}, {transform_indices = @transform_2, window_bounds = array<i64: 16, 128>}, {transform_indices = @transform_3, window_bounds = array<i64: 16, 128>}]} {
    %c0 = arith.constant 0 : index
    %c0_0 = arith.constant 0 : index
    %0 = vector.load %arg1[%c0, %c0_0] : memref<16x128xf32, #tpu.memory_space<vmem>>, vector<16x128xf32>
    %cst = arith.constant 5.000000e-01 : f32
    %1 = vector.broadcast %cst : f32 to vector<16x128xf32>
    %2 = arith.mulf %0, %1 : vector<16x128xf32>
    %c0_1 = arith.constant 0 : index
    %c0_2 = arith.constant 0 : index
    %3 = vector.load %arg2[%c0_1, %c0_2] : memref<16x128xf32, #tpu.memory_space<vmem>>, vector<16x128xf32>
    %cst_3 = arith.constant 1.500000e+00 : f32
    %4 = vector.broadcast %cst_3 : f32 to vector<16x128xf32>
    %5 = arith.mulf %3, %4 : vector<16x128xf32>
    %6 = arith.addf %2, %5 : vector<16x128xf32>
    %c0_4 = arith.constant 0 : index
    %c0_5 = arith.constant 0 : index
    %7 = vector.load %arg3[%c0_4, %c0_5] : memref<16x128xf32, #tpu.memory_space<vmem>>, vector<16x128xf32>
    %cst_6 = arith.constant -2.000000e+00 : f32
    %8 = vector.broadcast %cst_6 : f32 to vector<16x128xf32>
    %9 = arith.mulf %7, %8 : vector<16x128xf32>
    %10 = arith.addf %6, %9 : vector<16x128xf32>
    %c0_7 = arith.constant 0 : index
    %c0_8 = arith.constant 0 : index
    %11 = vector.load %arg4[%c0_7, %c0_8] : memref<16x128xf32, #tpu.memory_space<vmem>>, vector<16x128xf32>
    tpu.vector_store %arg4[%c0_7, %c0_8], %10 {strides = array<i32>} : memref<16x128xf32, #tpu.memory_space<vmem>>, vector<16x128xf32>,
    return
  }
  func.func @transform_0(%arg0: i32) -> (i32, i32) {
    %c0_i32 = arith.constant 0 : i32
    %c0_i32_0 = arith.constant 0 : i32
    return %arg0, %c0_i32 : i32, i32
  }
  func.func @transform_1(%arg0: i32) -> (i32, i32) {
    %c0_i32 = arith.constant 0 : i32
    %c0_i32_0 = arith.constant 0 : i32
    return %arg0, %c0_i32 : i32, i32
  }
  func.func @transform_2(%arg0: i32) -> (i32, i32) {
    %c0_i32 = arith.constant 0 : i32
    %c0_i32_0 = arith.constant 0 : i32
    return %arg0, %c0_i32 : i32, i32
  }
  func.func @transform_3(%arg0: i32) -> (i32, i32) {
    %c0_i32 = arith.constant 0 : i32
    %c0_i32_0 = arith.constant 0 : i32
    return %arg0, %c0_i32 : i32, i32
  }
}

</mosaic_0001>

<bundles_post_ra>
// kernel: tpu_custom_call.1
= control target key start
LH: loop header
LB: loop body
LE: loop exit
PB: predicated region body
PF: predicated region fallthrough
CT: control target
= control target key end

     0   :  { %8 = vsyncpa [#allocation3], 0  ;;  %s285_s0 = inlined_call_operand.hbm [shape: f32[16,128], index: 0, kind: input, shape index: {}]   ;;  %s286_s1 = inlined_call_operand.hbm [shape: f32[16,128], index: 1, kind: input, shape index: {}]   ;;  %s287_s2 = inlined_call_operand.hbm [shape: f32[16,128], index: 2, kind: input, shape index: {}]   ;;  %s288_s3 = inlined_call_operand.hbm [shape: f32[16,128], index: 3, kind: output, shape index: {}]  }
   0x1   :  { %9 = vsyncpa [#allocation6], 0 }
   0x2   :  { %10 = vsyncpa [#allocation4], 0  ;;  %s192_s12 = smov [#allocation5]   ;;  %s193_s14 = smov [#allocation2]  }
   0x3   :  { %s28_s13 = sshll.u32 %s192_s12, 4  ;;  %s16_s15 = sshll.u32 %s193_s14, 4  ;;  %s29_s13 = int_to_ptr.vmem [resolvable:$true] %s28_s13  ;;  %s218_s15 = int_to_ptr.vmem [resolvable:$true] %s16_s15 }
   0x4   :  { %s98_s18 = scalar_lea.hbm %s286_s1, 256 }
   0x5   :  { %p99_p0 = scmp.ne.s32.totalorder %s286_s1, %s98_s18  ;;  %p102_p1 = scmp.lt.u32.totalorder %s98_s18, %s286_s1 }
   0x7   :  { %p104_p2 = pnand %p102_p1, %p99_p0 }
   0x9   :  { %107 = shalt.err (!%p104_p2)
}
   0xa   :  { %s108_s23 = scalar_lea.vmem %s29_s13, 256  ;;  %p113_p4 = scmp.lt.s32.totalorder %s29_s13, %s29_s13 }
   0xb   :  { %p109_p3 = scmp.ne.s32.totalorder %s29_s13, %s108_s23  ;;  %p114_p5 = scmp.lt.s32.totalorder %s108_s23, %s108_s23 }
   0xd   :  { %p115_p6 = por %p114_p5, %p113_p4 }
   0xf   :  { %p116_p7 = pnand %p115_p6, %p109_p3 }
  0x11   :  { %119 = shalt.err (!%p116_p7)
}
  0x12   :  { %s194_s24 = smov 128   ;;  %s195_s25 = smov 8  }
  0x13   :  { %34 = dma.hbm_to_vmem [thread:$0]  %s286_s1, 256, %s29_s13, [#allocation6], %s194_s24, %s194_s24, %s195_s25  }
  0x14   :  { %s120_s30 = scalar_lea.hbm %s285_s0, 256 }
  0x15   :  { %p121_p8 = scmp.ne.s32.totalorder %s285_s0, %s120_s30  ;;  %p124_p9 = scmp.lt.u32.totalorder %s120_s30, %s285_s0 }
  0x17   :  { %p126_p10 = pnand %p124_p9, %p121_p8 }
  0x19   :  { %129 = shalt.err (!%p126_p10)
}
  0x1a   :  { %s130_s8 = scalar_lea.vmem %s218_s15, 256  ;;  %p135_p12 = scmp.lt.s32.totalorder %s218_s15, %s218_s15 }
  0x1b   :  { %p131_p11 = scmp.ne.s32.totalorder %s218_s15, %s130_s8  ;;  %p136_p13 = scmp.lt.s32.totalorder %s130_s8, %s130_s8 }
  0x1d   :  { %p137_p0 = por %p136_p13, %p135_p12 }
  0x1f   :  { %p138_p1 = pnand %p137_p0, %p131_p11 }
  0x21   :  { %141 = shalt.err (!%p138_p1)
}
  0x22   :  { %22 = dma.hbm_to_vmem [thread:$0]  %s285_s0, 256, %s218_s15, [#allocation3], %s194_s24, %s194_s24, %s195_s25  }
  0x23   :  { %s196_s10 = smov [#allocation7]   ;;  %s142_s14 = scalar_lea.hbm %s287_s2, 256 }
  0x24   :  { %s40_s11 = sshll.u32 %s196_s10, 4  ;;  %p143_p2 = scmp.ne.s32.totalorder %s287_s2, %s142_s14  ;;  %s41_s11 = int_to_ptr.vmem [resolvable:$true] %s40_s11 }
  0x25   :  { %p146_p3 = scmp.lt.u32.totalorder %s142_s14, %s287_s2 }
  0x27   :  { %p148_p4 = pnand %p146_p3, %p143_p2 }
  0x29   :  { %151 = shalt.err (!%p148_p4)
}
  0x2a   :  { %s152_s20 = scalar_lea.vmem %s41_s11, 256  ;;  %p157_p6 = scmp.lt.s32.totalorder %s41_s11, %s41_s11 }
  0x2b   :  { %p153_p5 = scmp.ne.s32.totalorder %s41_s11, %s152_s20  ;;  %p158_p7 = scmp.lt.s32.totalorder %s152_s20, %s152_s20 }
  0x2d   :  { %p159_p8 = por %p158_p7, %p157_p6 }
  0x2f   :  { %p160_p9 = pnand %p159_p8, %p153_p5 }
  0x31   :  { %163 = shalt.err (!%p160_p9)
}
  0x32   :  { %46 = dma.hbm_to_vmem [thread:$0]  %s287_s2, 256, %s41_s11, [#allocation6], %s194_s24, %s194_s24, %s195_s25  }
  0x33   :  { %186 = dma.done.wait [#allocation3], 256  }
  0x34   :  { %187 = vsyncadd [#allocation3], 4294967040 }
  0x35   :  { %188 = dma.done.wait [#allocation6], 512  }
  0x36   :  { %189 = vsyncadd [#allocation6], 4294966784  ;;  %v56_v0 = vld [vmem:[#allocation2] sm:$0xff]  ;;  %v60_v1 = vld [vmem:[#allocation5] sm:$0xff]  ;;  %s197_s21 = smov [#allocation8]  }
  0x37   :  { %v66_v2 = vld [vmem:[#allocation7] sm:$0xff]  ;;  %v58_v3 = vmul.f32 0.5, %v56_v0  ;;  %v62_v4 = vmul.f32 1.5, %v60_v1  ;;  %v57_v6 = vld [vmem:[#allocation2 + $0x8] sm:$0xff]  ;;  %v61_v7 = vld [vmem:[#allocation5 + $0x8] sm:$0xff]  ;;  %s79_s22 = sshll.u32 %s197_s21, 4  ;;  %s80_s22 = int_to_ptr.vmem [resolvable:$true] %s79_s22 }
  0x38   :  { %v68_v5 = vmul.f32 -2.0, %v66_v2  ;;  %v67_v8 = vld [vmem:[#allocation7 + $0x8] sm:$0xff]  ;;  %v59_v9 = vmul.f32 0.5, %v57_v6  ;;  %v63_v10 = vmul.f32 1.5, %v61_v7  ;;  %s164_s2 = scalar_lea.vmem %s80_s22, 256  ;;  %p169_p11 = scmp.lt.s32.totalorder %s80_s22, %s80_s22 }
  0x39   :  { %v69_v11 = vmul.f32 -2.0, %v67_v8  ;;  %v64_v12 = vadd.f32 %v62_v4, %v58_v3  ;;  %p165_p10 = scmp.ne.s32.totalorder %s80_s22, %s164_s2  ;;  %p170_p12 = scmp.lt.s32.totalorder %s164_s2, %s164_s2 }
  0x3a   :  { %v65_v13 = vadd.f32 %v63_v10, %v59_v9 }
  0x3b   :  { %v70_v14 = vadd.f32 %v68_v5, %v64_v12  ;;  %p171_p13 = por %p170_p12, %p169_p11 }
  0x3c   :  { %v71_v15 = vadd.f32 %v69_v11, %v65_v13 }
  0x3d   :  { %72 = vst [vmem:[#allocation8] sm:$0xff] %v70_v14  ;;  %p172_p0 = pnand %p171_p13, %p165_p10 }
  0x3e   :  { %73 = vst [vmem:[#allocation8 + $0x8] sm:$0xff] %v71_v15 }
  0x3f   :  { %175 = shalt.err (!%p172_p0)
}
  0x40   :  { %s176_s27 = scalar_lea.hbm %s288_s3, 256 }
  0x41   :  { %p177_p1 = scmp.ne.s32.totalorder %s288_s3, %s176_s27  ;;  %p180_p2 = scmp.lt.u32.totalorder %s176_s27, %s288_s3 }
  0x43   :  { %p182_p3 = pnand %p180_p2, %p177_p1 }
  0x45   :  { %185 = shalt.err (!%p182_p3)
}
  0x46   :  { %85 = dma.vmem_to_hbm [thread:$0]  %s80_s22, 256, %s288_s3, [#allocation4], %s194_s24, %s194_s24, %s195_s25  }
  0x47   :  { %190 = dma.done.wait [#allocation4], 256  }
  0x48   :  { %191 = vsyncadd [#allocation4], 4294967040 }
  0x49   :  { %89 = vsyncpa [#allocation3], 1 }
  0x4a   :  { %90 = vsyncpa [#allocation6], 1 }
  0x4b   :  { %91 = vsyncpa [#allocation4], 1 }

</bundles_post_ra>
